<compile_context>
chip_gen: v7x
topology: tpu7x:2x2x1
jax: 0.10.0
libtpu: 0.0.40
codegen_flags: <defaults>
</compile_context>

<pallas_src>
import jax
import jax.numpy as jnp
from jax.experimental import pallas as pl
from jax.experimental.pallas import tpu as pltpu


def _round_up(x, m):
    return ((x + m - 1) // m) * m


def _cdiv(a, b):
    return -(-a // b)


def value_mlp_kernel(x_ref, w1_ref, b1_ref, w2_ref, b2_ref, w3_ref, b3_ref,
                     out_ref):
    """Fused Linear->ReLU->Linear->ReLU->Linear(1) on one (TB, S) batch tile.

    Weights arrive pre-cast (f32 or bf16) and stay VMEM-resident across the
    grid; all accumulation, bias adds and ReLUs are f32. The 1-wide head is a
    VPU multiply + cross-lane reduce so the output tile stays (TB, 1).
    """
    h1 = jnp.dot(x_ref[...], w1_ref[...],
                 preferred_element_type=jnp.float32) + b1_ref[...]
    h1 = jnp.maximum(h1, 0.0)                                 # ReLU (f32)

    h2 = jnp.dot(h1.astype(w2_ref.dtype), w2_ref[...],
                 preferred_element_type=jnp.float32) + b2_ref[...]
    h2 = jnp.maximum(h2, 0.0)                                 # ReLU (f32)

    # Head: (TB, H) * (1, H) broadcast + lane reduce -> (TB, 1).
    prod = h2 * w3_ref[...].astype(jnp.float32)
    out_ref[...] = jnp.sum(prod, axis=-1, keepdims=True) + b3_ref[...]


def _choose_batch_tiling(B, tb, sublane):
    """Pad B only to the sublane quantum; pick an even tile count when it helps."""
    B_min = _round_up(max(B, 1), sublane)
    n = _cdiv(B_min, tb)
    if n == 1:
        # Split a large single tile in two so both v7x TensorCores get work;
        # each half must still amortize the per-grid-step overhead.
        if B_min >= 1024:
            n = 2
    elif n % 2 == 1:
        n += 1  # even grid count -> balanced megacore sharding on v7x
    TB = _round_up(_cdiv(B_min, n), sublane)
    # Waste is at most ~n * sublane rows (<1%), never up to a full tile.
    return TB, n * TB


def value_network_forward(state, params, *, use_bf16=False, tb=2048):
    """Batch-tiled pallas_call; weights resident, x/out streamed per tile."""
    w1, b1, w2, b2, w3, b3 = params
    B, S = state.shape
    H = w1.shape[1]

    mm_dtype = jnp.bfloat16 if use_bf16 else jnp.float32
    sublane = 16 if use_bf16 else 8
    TB, B_pad = _choose_batch_tiling(B, tb, sublane)
    grid = (B_pad // TB,)

    # x streamed at natural feature width; only the batch dim is padded.
    x = state.astype(mm_dtype)
    if B_pad != B:
        x = jnp.pad(x, ((0, B_pad - B), (0, 0)))

    # Pre-cast weights once in the wrapper (bf16 path); biases stay f32.
    w1_c = w1.astype(mm_dtype)
    w2_c = w2.astype(mm_dtype)
    w3_row = w3.reshape(1, H).astype(mm_dtype)       # (1, H) lane-dense head
    b1_c = b1.reshape(1, H).astype(jnp.float32)
    b2_c = b2.reshape(1, H).astype(jnp.float32)
    b3_c = b3.reshape(1, 1).astype(jnp.float32)

    resident = lambda shp: pl.BlockSpec(shp, lambda i: (0, 0))

    itemsize = jnp.dtype(mm_dtype).itemsize
    flops = 2 * B_pad * (S * H + H * H + H)
    bytes_accessed = (B_pad * S * itemsize            # streamed x
                      + 4 * B_pad                     # narrow f32 output
                      + itemsize * (S * H + H * H + H)  # weights (one pass)
                      + 4 * (2 * H + 1))              # biases

    out = pl.pallas_call(
        value_mlp_kernel,
        out_shape=jax.ShapeDtypeStruct((B_pad, 1), jnp.float32),
        grid=grid,
        in_specs=[
            pl.BlockSpec((TB, S), lambda i: (i, 0)),  # streamed batch tile
            resident((S, H)), resident((1, H)),
            resident((H, H)), resident((1, H)),
            resident((1, H)), resident((1, 1)),
        ],
        out_specs=pl.BlockSpec((TB, 1), lambda i: (i, 0)),
        compiler_params=pltpu.CompilerParams(
            dimension_semantics=("parallel",)),
        cost_estimate=pl.CostEstimate(
            flops=flops, transcendentals=0, bytes_accessed=bytes_accessed),
    )(x, w1_c, b1_c, w2_c, b2_c, w3_row, b3_c)

    return out[:B]


def init_params(key, state_dim, hidden_dim=128):
    """Matches the PyTorch module: W ~ N(0, 0.1), b = 0.01, head width 1."""
    k1, k2, k3 = jax.random.split(key, 3)
    w1 = 0.1 * jax.random.normal(k1, (state_dim, hidden_dim), jnp.float32)
    w2 = 0.1 * jax.random.normal(k2, (hidden_dim, hidden_dim), jnp.float32)
    w3 = 0.1 * jax.random.normal(k3, (hidden_dim, 1), jnp.float32)
    b1 = jnp.full((1, hidden_dim), 0.01, jnp.float32)
    b2 = jnp.full((1, hidden_dim), 0.01, jnp.float32)
    b3 = jnp.full((1, 1), 0.01, jnp.float32)
    return (w1, b1, w2, b2, w3, b3)


def value_network_ref(state, params):
    """Pure-JAX reference for correctness checking."""
    w1, b1, w2, b2, w3, b3 = params
    h1 = jnp.maximum(state @ w1 + b1, 0.0)
    h2 = jnp.maximum(h1 @ w2 + b2, 0.0)
    return h2 @ w3 + b3


if __name__ == "__main__":
    key = jax.random.PRNGKey(0)
    k_state, k_params, k_big = jax.random.split(key, 3)

    batch = 8
    state_dim = 16
    hidden_dim = 128

    state = jax.random.normal(k_state, (batch, state_dim), jnp.float32)
    params = init_params(k_params, state_dim, hidden_dim)
    ref = value_network_ref(state, params)

    # f32 path, single tile: must match the PyTorch-equivalent reference.
    out = value_network_forward(state, params, use_bf16=False)
    out = jax.block_until_ready(out)
    assert out.shape == (batch, 1)
    assert jnp.allclose(out, ref, atol=1e-4, rtol=1e-4)

    # bf16 MXU-feed path (perf variant): f32 accumulation, looser tolerance.
    out_bf16 = value_network_forward(state, params, use_bf16=True)
    out_bf16 = jax.block_until_ready(out_bf16)
    assert out_bf16.shape == (batch, 1)
    assert jnp.allclose(out_bf16, ref, atol=1e-1, rtol=1e-1)

    # Multi-tile path (grid=(2,), batch padded only to the sublane quantum).
    big_b = 1100
    big_state = jax.random.normal(k_big, (big_b, state_dim), jnp.float32)
    big_ref = value_network_ref(big_state, params)
    big_out = jax.block_until_ready(
        value_network_forward(big_state, params, use_bf16=False))
    assert big_out.shape == (big_b, 1)
    assert jnp.allclose(big_out, big_ref, atol=1e-4, rtol=1e-4)

    print("KERNEL_OK")
</pallas_src>

<mosaic_0001>
module attributes {stable_mosaic.version = 11 : i64} {
  func.func @value_mlp_kernel(%arg0: i32, %arg1: memref<8x16xf32, #tpu.memory_space<vmem>>, %arg2: memref<16x128xf32, #tpu.memory_space<vmem>>, %arg3: memref<1x128xf32, #tpu.memory_space<vmem>>, %arg4: memref<128x128xf32, #tpu.memory_space<vmem>>, %arg5: memref<1x128xf32, #tpu.memory_space<vmem>>, %arg6: memref<1x128xf32, #tpu.memory_space<vmem>>, %arg7: memref<1x1xf32, #tpu.memory_space<vmem>>, %arg8: memref<8x1xf32, #tpu.memory_space<vmem>>) attributes {dimension_semantics = [#tpu.dimension_semantics<parallel>], iteration_bounds = array<i64: 1>, scalar_prefetch = 0 : i64, scratch_operands = 0 : i64, tpu.core_type = #tpu.core_type<tc>, window_params = [{transform_indices = @transform_0, window_bounds = array<i64: 8, 16>}, {pipeline_mode = #tpu.pipeline_mode<synchronous>, transform_indices = @transform_1, window_bounds = array<i64: 16, 128>}, {pipeline_mode = #tpu.pipeline_mode<synchronous>, transform_indices = @transform_2, window_bounds = array<i64: 1, 128>}, {pipeline_mode = #tpu.pipeline_mode<synchronous>, transform_indices = @transform_3, window_bounds = array<i64: 128, 128>}, {pipeline_mode = #tpu.pipeline_mode<synchronous>, transform_indices = @transform_4, window_bounds = array<i64: 1, 128>}, {pipeline_mode = #tpu.pipeline_mode<synchronous>, transform_indices = @transform_5, window_bounds = array<i64: 1, 128>}, {pipeline_mode = #tpu.pipeline_mode<synchronous>, transform_indices = @transform_6, window_bounds = array<i64: 1, 1>}, {transform_indices = @transform_7, window_bounds = array<i64: 8, 1>}]} {
    %c0 = arith.constant 0 : index
    %c0_0 = arith.constant 0 : index
    %0 = vector.load %arg1[%c0, %c0_0] : memref<8x16xf32, #tpu.memory_space<vmem>>, vector<8x16xf32>
    %c0_1 = arith.constant 0 : index
    %c0_2 = arith.constant 0 : index
    %1 = vector.load %arg2[%c0_1, %c0_2] : memref<16x128xf32, #tpu.memory_space<vmem>>, vector<16x128xf32>
    %cst = arith.constant dense<0.000000e+00> : vector<8x128xf32>
    %2 = tpu.matmul %0, %1, %cst {dimension_numbers = #tpu.dot_dimension_numbers<[1], [0], [0], [1], [0, 0, 1, 1], [], []>} : vector<8x16xf32>, vector<16x128xf32>, vector<8x128xf32> -> vector<8x128xf32>
    %c0_3 = arith.constant 0 : index
    %c0_4 = arith.constant 0 : index
    %3 = vector.load %arg3[%c0_3, %c0_4] : memref<1x128xf32, #tpu.memory_space<vmem>>, vector<1x128xf32>
    %4 = vector.broadcast %3 : vector<1x128xf32> to vector<8x128xf32>
    %5 = arith.addf %2, %4 : vector<8x128xf32>
    %cst_5 = arith.constant 0.000000e+00 : f32
    %6 = vector.broadcast %cst_5 : f32 to vector<8x128xf32>
    %7 = arith.maximumf %5, %6 : vector<8x128xf32>
    %c0_6 = arith.constant 0 : index
    %c0_7 = arith.constant 0 : index
    %8 = vector.load %arg4[%c0_6, %c0_7] : memref<128x128xf32, #tpu.memory_space<vmem>>, vector<128x128xf32>
    %cst_8 = arith.constant dense<0.000000e+00> : vector<8x128xf32>
    %9 = tpu.matmul %7, %8, %cst_8 {dimension_numbers = #tpu.dot_dimension_numbers<[1], [0], [0], [1], [0, 0, 1, 1], [], []>} : vector<8x128xf32>, vector<128x128xf32>, vector<8x128xf32> -> vector<8x128xf32>
    %c0_9 = arith.constant 0 : index
    %c0_10 = arith.constant 0 : index
    %10 = vector.load %arg5[%c0_9, %c0_10] : memref<1x128xf32, #tpu.memory_space<vmem>>, vector<1x128xf32>
    %11 = vector.broadcast %10 : vector<1x128xf32> to vector<8x128xf32>
    %12 = arith.addf %9, %11 : vector<8x128xf32>
    %cst_11 = arith.constant 0.000000e+00 : f32
    %13 = vector.broadcast %cst_11 : f32 to vector<8x128xf32>
    %14 = arith.maximumf %12, %13 : vector<8x128xf32>
    %c0_12 = arith.constant 0 : index
    %c0_13 = arith.constant 0 : index
    %15 = vector.load %arg6[%c0_12, %c0_13] : memref<1x128xf32, #tpu.memory_space<vmem>>, vector<1x128xf32>
    %16 = vector.broadcast %15 : vector<1x128xf32> to vector<8x128xf32>
    %17 = arith.mulf %14, %16 : vector<8x128xf32>
    %cst_14 = arith.constant dense<0.000000e+00> : vector<8xf32>
    %18 = vector.multi_reduction <add>, %17, %cst_14 [1] : vector<8x128xf32> to vector<8xf32>
    %19 = vector.shape_cast %18 : vector<8xf32> to vector<8x1xf32>
    %c0_15 = arith.constant 0 : index
    %c0_16 = arith.constant 0 : index
    %20 = vector.load %arg7[%c0_15, %c0_16] : memref<1x1xf32, #tpu.memory_space<vmem>>, vector<1x1xf32>
    %21 = vector.broadcast %20 : vector<1x1xf32> to vector<8x1xf32>
    %22 = arith.addf %19, %21 : vector<8x1xf32>
    %c0_17 = arith.constant 0 : index
    %c0_18 = arith.constant 0 : index
    %23 = vector.load %arg8[%c0_17, %c0_18] : memref<8x1xf32, #tpu.memory_space<vmem>>, vector<8x1xf32>
    tpu.vector_store %arg8[%c0_17, %c0_18], %22 {strides = array<i32>} : memref<8x1xf32, #tpu.memory_space<vmem>>, vector<8x1xf32>,
    return
  }
  func.func @transform_0(%arg0: i32) -> (i32, i32) {
    %c0_i32 = arith.constant 0 : i32
    %c0_i32_0 = arith.constant 0 : i32
    return %arg0, %c0_i32 : i32, i32
  }
  func.func @transform_1(%arg0: i32) -> (i32, i32) {
    %c0_i32 = arith.constant 0 : i32
    %c0_i32_0 = arith.constant 0 : i32
    %c0_i32_1 = arith.constant 0 : i32
    return %c0_i32, %c0_i32_0 : i32, i32
  }
  func.func @transform_2(%arg0: i32) -> (i32, i32) {
    %c0_i32 = arith.constant 0 : i32
    %c0_i32_0 = arith.constant 0 : i32
    %c0_i32_1 = arith.constant 0 : i32
    return %c0_i32, %c0_i32_0 : i32, i32
  }
  func.func @transform_3(%arg0: i32) -> (i32, i32) {
    %c0_i32 = arith.constant 0 : i32
    %c0_i32_0 = arith.constant 0 : i32
    %c0_i32_1 = arith.constant 0 : i32
    return %c0_i32, %c0_i32_0 : i32, i32
  }
  func.func @transform_4(%arg0: i32) -> (i32, i32) {
    %c0_i32 = arith.constant 0 : i32
    %c0_i32_0 = arith.constant 0 : i32
    %c0_i32_1 = arith.constant 0 : i32
    return %c0_i32, %c0_i32_0 : i32, i32
  }
  func.func @transform_5(%arg0: i32) -> (i32, i32) {
    %c0_i32 = arith.constant 0 : i32
    %c0_i32_0 = arith.constant 0 : i32
    %c0_i32_1 = arith.constant 0 : i32
    return %c0_i32, %c0_i32_0 : i32, i32
  }
  func.func @transform_6(%arg0: i32) -> (i32, i32) {
    %c0_i32 = arith.constant 0 : i32
    %c0_i32_0 = arith.constant 0 : i32
    %c0_i32_1 = arith.constant 0 : i32
    return %c0_i32, %c0_i32_0 : i32, i32
  }
  func.func @transform_7(%arg0: i32) -> (i32, i32) {
    %c0_i32 = arith.constant 0 : i32
    %c0_i32_0 = arith.constant 0 : i32
    return %arg0, %c0_i32 : i32, i32
  }
}

</mosaic_0001>

<bundles_post_ra>
// kernel: tpu_custom_call.1
= control target key start
LH: loop header
LB: loop body
LE: loop exit
PB: predicated region body
PF: predicated region fallthrough
CT: control target
= control target key end

     0   :  { %s549_s0 = inlined_call_operand.hbm [shape: f32[8,16], index: 0, kind: input, shape index: {}]   ;;  %s550_s1 = inlined_call_operand.hbm [shape: f32[16,128], index: 1, kind: input, shape index: {}]   ;;  %s551_s2 = inlined_call_operand.vmem [shape: f32[1,128], index: 2, kind: input, shape index: {}]   ;;  %s552_s3 = inlined_call_operand.hbm [shape: f32[128,128], index: 3, kind: input, shape index: {}]   ;;  %s553_s4 = inlined_call_operand.vmem [shape: f32[1,128], index: 4, kind: input, shape index: {}]   ;;  %s554_s5 = inlined_call_operand.vmem [shape: f32[1,128], index: 5, kind: input, shape index: {}]   ;;  %s555_s6 = inlined_call_operand.<no memory space> [shape: f32[1,1], index: 6, kind: input, shape index: {}]   ;;  %s556_s7 = inlined_call_operand.vmem [shape: f32[8,1], index: 7, kind: output, shape index: {}]  }
   0x1   :  { %v12_v0 = vstv %s555_s6 }
   0x2   :  { %13 = vst [vmem:[#allocation2] sm:$0x1] %v12_v0 }
   0x3   :  { %14 = vsyncpa [#allocation4], 0 }
   0x4   :  { %15 = vsyncpa [#allocation6], 0  ;;  %s444_s26 = smov [#allocation5]   ;;  %s374_s30 = scalar_lea.hbm %s550_s1, 256 }
   0x5   :  { %s31_s27 = sshll.u32 %s444_s26, 4  ;;  %p375_p0 = scmp.ne.s32.totalorder %s550_s1, %s374_s30  ;;  %s32_s27 = int_to_ptr.vmem [resolvable:$true] %s31_s27 }
   0x6   :  { %p378_p1 = scmp.lt.u32.totalorder %s374_s30, %s550_s1 }
   0x8   :  { %p380_p2 = pnand %p378_p1, %p375_p0 }
   0xa   :  { %383 = shalt.err (!%p380_p2)
}
   0xb   :  { %s384_s6 = scalar_lea.vmem %s32_s27, 256  ;;  %p389_p4 = scmp.lt.s32.totalorder %s32_s27, %s32_s27 }
   0xc   :  { %p385_p3 = scmp.ne.s32.totalorder %s32_s27, %s384_s6  ;;  %p390_p5 = scmp.lt.s32.totalorder %s384_s6, %s384_s6 }
   0xe   :  { %p391_p6 = por %p390_p5, %p389_p4 }
  0x10   :  { %p392_p7 = pnand %p391_p6, %p385_p3 }
  0x12   :  { %395 = shalt.err (!%p392_p7)
}
  0x13   :  { %s445_s12 = smov 128   ;;  %s446_s13 = smov 8  }
  0x14   :  { %37 = dma.hbm_to_vmem [thread:$0]  %s550_s1, 256, %s32_s27, [#allocation6], %s445_s12, %s445_s12, %s446_s13  }
  0x15   :  { %s447_s16 = smov [#allocation3]   ;;  %s448_s18 = smov [#allocation7]  }
  0x16   :  { %s22_s17 = sshll.u32 %s447_s16, 4  ;;  %s45_s19 = sshll.u32 %s448_s18, 4  ;;  %s23_s17 = int_to_ptr.vmem [resolvable:$true] %s22_s17  ;;  %s46_s19 = int_to_ptr.vmem [resolvable:$true] %s45_s19 }
  0x17   :  { %s396_s22 = scalar_lea.hbm %s549_s0, 128 }
  0x18   :  { %p397_p8 = scmp.ne.s32.totalorder %s549_s0, %s396_s22  ;;  %p400_p9 = scmp.lt.u32.totalorder %s396_s22, %s549_s0 }
  0x1a   :  { %p402_p10 = pnand %p400_p9, %p397_p8 }
  0x1c   :  { %405 = shalt.err (!%p402_p10)
}
  0x1d   :  { %s406_s1 = scalar_lea.vmem %s23_s17, 128  ;;  %p411_p12 = scmp.lt.s32.totalorder %s23_s17, %s23_s17 }
  0x1e   :  { %p407_p11 = scmp.ne.s32.totalorder %s23_s17, %s406_s1  ;;  %p412_p13 = scmp.lt.s32.totalorder %s406_s1, %s406_s1 }
  0x20   :  { %p413_p0 = por %p412_p13, %p411_p12 }
  0x22   :  { %p414_p1 = pnand %p413_p0, %p407_p11 }
  0x24   :  { %417 = shalt.err (!%p414_p1)
}
  0x25   :  { %25 = dma.hbm_to_vmem [thread:$0]  %s549_s0, 128, %s23_s17, [#allocation4]  }
  0x26   :  { %s418_s8 = scalar_lea.hbm %s552_s3, 2048 }
  0x27   :  { %p419_p2 = scmp.ne.s32.totalorder %s552_s3, %s418_s8  ;;  %p422_p3 = scmp.lt.u32.totalorder %s418_s8, %s552_s3 }
  0x29   :  { %p424_p4 = pnand %p422_p3, %p419_p2 }
  0x2b   :  { %427 = shalt.err (!%p424_p4)
}
  0x2c   :  { %s428_s14 = scalar_lea.vmem %s46_s19, 2048  ;;  %p433_p6 = scmp.lt.s32.totalorder %s46_s19, %s46_s19 }
  0x2d   :  { %p429_p5 = scmp.ne.s32.totalorder %s46_s19, %s428_s14  ;;  %p434_p7 = scmp.lt.s32.totalorder %s428_s14, %s428_s14 }
  0x2f   :  { %p435_p8 = por %p434_p7, %p433_p6 }
  0x31   :  { %p436_p9 = pnand %p435_p8, %p429_p5 }
  0x33   :  { %439 = shalt.err (!%p436_p9)
}
  0x34   :  { %51 = dma.hbm_to_vmem [thread:$0]  %s552_s3, 2048, %s46_s19, [#allocation6], %s445_s12, %s445_s12, %s446_s13  }
  0x35   :  { %440 = dma.done.wait [#allocation4], 128  }
  0x36   :  { %441 = vsyncadd [#allocation4], 4294967168 }
  0x37   :  { %442 = dma.done.wait [#allocation6], 2304  }
  0x38   :  { %443 = vsyncadd [#allocation6], 4294964992  ;;  %v449_v1 = vmov 0.0|0.0   ;;  %vm450_vm0 = vmmov 0   ;;  %v451_v2 = vmov 0.0   ;;  %v68_v3 = vld [vmem:[#allocation5] sm:$0xff] }
  0x39   :  { %339 = vmatprep.subr.bf16.mxu0 %v449_v1  ;;  %301 = vmatprep.mubr.msk.f32.mxu0 %vm450_vm0, %v451_v2  ;;  %v69_v4 = vld [vmem:[#allocation5 + $0x8] sm:$0xff]  ;;  %v152_v6 = vld [vmem:[#allocation7] sm:$0xff]  ;;  %v153_v7 = vld [vmem:[#allocation7 + $0x8] sm:$0xff]  ;;  %vm77_vm1 = vcmask 130048   ;;  %vm264_vm2 = vcmask 7168  }
  0x3a   :  { %342 = vmatprep.subr.bf16.mxu1 %v449_v1  ;;  %336 = vmatprep.mubr.msk.f32.mxu1 %vm450_vm0, %v451_v2  ;;  %v340_v5 = vpack.c.bf16 %v69_v4, %v68_v3  ;;  %v154_v8 = vld [vmem:[#allocation7 + $0x10] sm:$0xff]  ;;  %v343_v9 = vpack.c.bf16 %v153_v7, %v152_v6  ;;  %v155_v10 = vld [vmem:[#allocation7 + $0x18] sm:$0xff]  ;;  %v67_v11 = vld [vmem:[#allocation3] sm:$0xff] }
  0x3b   :  { %v346_v12 = vpack.c.bf16 %v155_v10, %v154_v8  ;;  %v156_v13 = vld [vmem:[#allocation7 + $0x20] sm:$0xff]  ;;  %v157_v14 = vld [vmem:[#allocation7 + $0x28] sm:$0xff]  ;;  %v158_v16 = vld [vmem:[#allocation7 + $0x30] sm:$0xff] }
  0x3c   :  { %341 = vmatpush3.bf16.msra.mxu0 %v340_v5  ;;  %344 = vmatpush3.bf16.msra.mxu1 %v343_v9  ;;  %v349_v15 = vpack.c.bf16 %v157_v14, %v156_v13  ;;  %v159_v17 = vld [vmem:[#allocation7 + $0x38] sm:$0xff]  ;;  %v160_v19 = vld [vmem:[#allocation7 + $0x40] sm:$0xff]  ;;  %v161_v20 = vld [vmem:[#allocation7 + $0x48] sm:$0xff] }
  0x3d   :  { %345 = vmatprep.subr.bf16.mxu1 %v449_v1  ;;  %v352_v18 = vpack.c.bf16 %v159_v17, %v158_v16  ;;  %v355_v21 = vpack.c.bf16 %v161_v20, %v160_v19  ;;  %v162_v22 = vld [vmem:[#allocation7 + $0x50] sm:$0xff]  ;;  %v163_v23 = vld [vmem:[#allocation7 + $0x58] sm:$0xff]  ;;  %v164_v25 = vld [vmem:[#allocation7 + $0x60] sm:$0xff] }
  0x3e   :  { %v358_v24 = vpack.c.bf16 %v163_v23, %v162_v22  ;;  %v165_v26 = vld [vmem:[#allocation7 + $0x68] sm:$0xff]  ;;  %v166_v28 = vld [vmem:[#allocation7 + $0x70] sm:$0xff]  ;;  %v167_v29 = vld [vmem:[#allocation7 + $0x78] sm:$0xff] }
  0x3f   :  { %302 = vmatmul.mubr.msk.f32.vlgmr.msra.gmra.mrb[0].mxu0 %vm77_vm1, %v67_v11  ;;  %v361_v27 = vpack.c.bf16 %v165_v26, %v164_v25  ;;  %v364_v30 = vpack.c.bf16 %v167_v29, %v166_v28  ;;  %v272_v31 = vld [vmem:[%s551_s2] ss:$0 sm:$0xff] }
  0x40   :  { %347 = vmatpush3.bf16.msra.mxu1 %v346_v12  ;;  %v274_v36 = vld [vmem:[%s553_s4] ss:$0 sm:$0xff] }
  0x41   :  { %348 = vmatprep.subr.bf16.mxu1 %v449_v1  ;;  %v275_v40 = vld [vmem:[%s554_s5] ss:$0 sm:$0xff] }
  0x42   :  { %v276_v43 = vld [vmem:[#allocation2] ss:$0 sm:$0xff] }
  0x44   :  { %350 = vmatpush3.bf16.msra.mxu1 %v349_v15 }
  0x45   :  { %351 = vmatprep.subr.bf16.mxu1 %v449_v1 }
  0x48   :  { %353 = vmatpush3.bf16.msra.mxu1 %v352_v18 }
  0x49   :  { %354 = vmatprep.subr.bf16.mxu1 %v449_v1 }
  0x4c   :  { %356 = vmatpush3.bf16.msra.mxu1 %v355_v21 }
  0x4d   :  { %357 = vmatprep.subr.bf16.mxu1 %v449_v1 }
  0x50   :  { %359 = vmatpush3.bf16.msra.mxu1 %v358_v24 }
  0x51   :  { %360 = vmatprep.subr.bf16.mxu1 %v449_v1 }
  0x54   :  { %362 = vmatpush3.bf16.msra.mxu1 %v361_v27 }
  0x55   :  { %363 = vmatprep.subr.bf16.mxu1 %v449_v1 }
  0x58   :  { %365 = vmatpush3.bf16.msra.mxu1 %v364_v30 }
 0x112   :  { %v147_v32 = vpop.f32.mrb[0].mxu0 }
 0x113   :  { %v148_v33 = vadd.f32 %v272_v31, %v147_v32  ;;  %v303_v34 = vpop.f32.mrb[1].mxu0 }
 0x115   :  { %v151_v35 = vmax.f32 %v148_v33, 0.0 }
 0x117   :  { %337 = vmatmul.mubr.f32.vlgmr.msra.gmra.mrb[0].mxu1 %v151_v35 }
 0x1ea   :  { %v241_v37 = vpop.f32.mrb[0].mxu1 }
 0x1eb   :  { %v242_v38 = vadd.f32 %v274_v36, %v241_v37  ;;  %v338_v39 = vpop.f32.mrb[1].mxu1 }
 0x1ed   :  { %v245_v41 = vmax.f32 %v242_v38, 0.0 }
 0x1ef   :  { %v253_v42 = vmul.f32 %v275_v40, %v245_v41 }
 0x1f1   :  { %254 = vadd.xlane.f32.xlu0 %v253_v42 }
 0x27e   :  { %v255_v44 = vpop.xlane.xlu0 %254 }
 0x27f   :  { %v263_v45 = vadd.f32 %v276_v43, %v255_v44 }
 0x281   :  { %265 = vst.msk [vmem:[%s556_s7] sm:$0xff] %vm264_vm2, %v263_v45 }
 0x282   :  { %270 = vsyncpa [#allocation4], 1 }
 0x283   :  { %271 = vsyncpa [#allocation6], 1 }

</bundles_post_ra>
